<compile_context>
chip_gen: v7x
topology: tpu7x:2x2x1
jax: 0.10.0
libtpu: 0.0.40
codegen_flags: <defaults>
</compile_context>

<pallas_src>
import math

import jax
import jax.numpy as jnp
from jax.experimental import pallas as pl
from jax.experimental.pallas import tpu as pltpu


# ----------------------------------------------------------------------------
# Kernel
# ----------------------------------------------------------------------------
def _make_dqn_kernel(n_layers):
    """Build a kernel for an n_layers-deep MLP (ReLU between layers, none at end).

    Ref order: x_ref, (w_ref, b_ref) * n_layers, o_ref.
    BN affines are already folded into the weights, so each layer is just
    matmul(bf16 x bf16 -> f32 acc) + bias (+ ReLU for hidden layers).
    """

    def kernel(*refs):
        x_ref = refs[0]
        o_ref = refs[-1]
        param_refs = refs[1:-1]

        h = x_ref[...]
        for li in range(n_layers):
            w = param_refs[2 * li][...]          # bf16 (fan_in, fan_out)
            b = param_refs[2 * li + 1][...]      # f32  (1, fan_out)
            h = jnp.dot(h.astype(w.dtype), w, preferred_element_type=jnp.float32)
            h = h + b                            # broadcasts over the batch tile
            if li < n_layers - 1:
                h = jnp.maximum(h, 0.0)
        o_ref[...] = h.astype(o_ref.dtype)

    return kernel


# ----------------------------------------------------------------------------
# Wrapper
# ----------------------------------------------------------------------------
_SUBLANE = 16  # bf16 sublane packing -> batch tile is a multiple of 16


def dqn_forward(x, params, *, target_grid_steps=2, max_batch_tile=2048):
    """Eval-mode forward of the DQN MLP in a single Pallas call.

    x: (B, input_size) float32
    params: flat tuple (w1, b1, ..., wL, bL) from prepare_params():
        BN affines folded into the weights, hidden dims padded to 128 lanes,
        weights bf16 (in_features, out_features), biases f32 (1, out_features).
    """
    assert len(params) % 2 == 0
    n_layers = len(params) // 2
    B, in_size = x.shape
    out_size = params[-2].shape[1]

    # --- choose batch tile: few fat grid steps, minimal batch padding -------
    steps = max(int(target_grid_steps), pl.cdiv(B, max_batch_tile), 1)
    tb = pl.cdiv(B, steps)
    tb = pl.cdiv(tb, _SUBLANE) * _SUBLANE        # multiple of 16 for bf16 packing
    b_pad = pl.cdiv(B, tb) * tb                  # no copy when B % tb == 0
    if b_pad != B:
        x = jnp.pad(x, ((0, b_pad - B), (0, 0)))
    grid = (b_pad // tb,)

    # x / out are tiled over the batch; weights & biases use a constant block
    # index so they stay VMEM-resident across grid steps.
    in_specs = [pl.BlockSpec((tb, in_size), lambda b: (b, 0))]
    in_specs += [pl.BlockSpec(p.shape, lambda b: (0, 0)) for p in params]
    # Un-padded (tb, out_size) output block: masked stores, but 32x less HBM
    # writeback than padding a 4-wide Q head to 128 lanes.
    out_specs = pl.BlockSpec((tb, out_size), lambda b: (b, 0))

    # --- cost estimate (lets XLA schedule around the kernel) ----------------
    flops = 0
    bytes_accessed = int(x.size) * x.dtype.itemsize + b_pad * out_size * 4
    for li in range(n_layers):
        w, bb = params[2 * li], params[2 * li + 1]
        flops += 2 * b_pad * int(w.shape[0]) * int(w.shape[1])
        bytes_accessed += int(w.size) * w.dtype.itemsize
        bytes_accessed += int(bb.size) * bb.dtype.itemsize
    cost = pl.CostEstimate(flops=flops, transcendentals=0,
                           bytes_accessed=bytes_accessed)

    # --- raise scoped-VMEM limit only if the tiles actually need it ---------
    widest = max(int(p.shape[1]) for p in params[0::2])
    vmem_est = 2 * (tb * in_size * 4 + tb * out_size * 4)            # x/out (2-buf)
    vmem_est += 2 * sum(int(p.size) * p.dtype.itemsize for p in params)
    vmem_est += 4 * tb * widest * 4                                  # activations
    vmem_limit = None
    if vmem_est > 12 * 1024 * 1024:
        vmem_limit = int(min(2 * vmem_est, 100 * 1024 * 1024))

    out = pl.pallas_call(
        _make_dqn_kernel(n_layers),
        out_shape=jax.ShapeDtypeStruct((b_pad, out_size), jnp.float32),
        grid=grid,
        in_specs=in_specs,
        out_specs=out_specs,
        compiler_params=pltpu.CompilerParams(
            dimension_semantics=("parallel",),   # shard batch across v7x's 2 TCs
            vmem_limit_bytes=vmem_limit),
        cost_estimate=cost,
    )(x, *params)

    return out[:B] if b_pad != B else out


# ----------------------------------------------------------------------------
# Parameters (mirror DQNNetwork.__init__ / _init_weights, eval-mode BN)
# ----------------------------------------------------------------------------
def init_raw_params(key, input_size, hidden_sizes, output_size):
    """Kaiming-normal Linear weights (stored transposed as (in, out)), zero
    biases; BN represented as per-feature (scale, shift) from PyTorch defaults
    (gamma=1, beta=0, running_mean=0, running_var=1, eps=1e-5).

    Returns a list of per-layer tuples:
      hidden layer: (w, b, bn_scale, bn_shift)
      final layer:  (w, b)
    """
    eps = 1e-5
    sizes = [input_size] + list(hidden_sizes) + [output_size]
    keys = jax.random.split(key, len(sizes) - 1)

    layers = []
    for li in range(len(sizes) - 1):
        fan_in, fan_out = sizes[li], sizes[li + 1]
        std = math.sqrt(2.0) / math.sqrt(fan_in)
        w = std * jax.random.normal(keys[li], (fan_in, fan_out), dtype=jnp.float32)
        b = jnp.zeros((1, fan_out), dtype=jnp.float32)
        if li < len(hidden_sizes):
            gamma = jnp.ones((1, fan_out), dtype=jnp.float32)
            beta = jnp.zeros((1, fan_out), dtype=jnp.float32)
            run_mean = jnp.zeros((1, fan_out), dtype=jnp.float32)
            run_var = jnp.ones((1, fan_out), dtype=jnp.float32)
            scale = gamma / jnp.sqrt(run_var + eps)
            shift = beta - run_mean * scale
            layers.append((w, b, scale, shift))
        else:
            layers.append((w, b))
    return layers


def prepare_params(raw_layers, *, lane=128, weight_dtype=jnp.bfloat16):
    """Fold eval-mode BN into the next Linear, pad hidden dims to 128 lanes,
    cast weights to bf16 (biases stay f32 for the post-accumulation add).

    relu_out * s + t feeding Linear(w, b) is exactly
    relu_out @ (s.T * w) + (t @ w + b), so the fold is exact.  Zero-padded
    hidden columns produce exact-zero activations that feed zero-padded weight
    rows in the next layer, so padding is exact too.

    Returns flat (w1, b1, w2', b2', ..., wL', bL').
    """
    # 1) fold BN affines into the NEXT layer (f32 math).
    folded = []
    pending = None  # (scale, shift) from the previous hidden layer's BN
    for layer in raw_layers:
        w, b = layer[0], layer[1]
        if pending is not None:
            s, t = pending
            b = b + t @ w
            w = w * s.T                       # row-scale: diag(s) @ w
        folded.append((w, b))
        pending = (layer[2], layer[3]) if len(layer) == 4 else None

    # 2) pad hidden output dims to a multiple of 128 lanes; the final layer's
    #    output dim is left as-is (stored with masked, narrow writes).
    n = len(folded)
    params = []
    prev_pad = 0
    for li, (w, b) in enumerate(folded):
        if prev_pad:
            w = jnp.pad(w, ((0, prev_pad), (0, 0)))     # zero rows for padded inputs
        if li < n - 1:
            fout = w.shape[1]
            pad_out = pl.cdiv(fout, lane) * lane - fout
            if pad_out:
                w = jnp.pad(w, ((0, 0), (0, pad_out)))
                b = jnp.pad(b, ((0, 0), (0, pad_out)))
            prev_pad = pad_out
        else:
            prev_pad = 0
        params.extend([w.astype(weight_dtype), b.astype(jnp.float32)])
    return tuple(params)


def reference_forward(x, raw_layers):
    """Plain-JAX f32 reference using the UNFOLDED params (Linear->ReLU->BN->Dropout)."""
    h = x
    for layer in raw_layers:
        w, b = layer[0], layer[1]
        h = h @ w + b
        if len(layer) == 4:                # hidden layer: ReLU -> BN(eval) -> Dropout(id)
            h = jnp.maximum(h, 0.0)
            h = h * layer[2] + layer[3]
    return h


# ----------------------------------------------------------------------------
# Demo / self-check
# ----------------------------------------------------------------------------
if __name__ == "__main__":
    batch = 20          # deliberately not a multiple of the batch tile
    input_size = 16
    hidden_sizes = [32, 32]
    output_size = 4

    key = jax.random.PRNGKey(0)
    k_x, k_p = jax.random.split(key)
    x = jax.random.normal(k_x, (batch, input_size), dtype=jnp.float32)

    raw = init_raw_params(k_p, input_size, hidden_sizes, output_size)
    params = prepare_params(raw)

    out = dqn_forward(x, params, target_grid_steps=2)
    out = jax.block_until_ready(out)

    ref = reference_forward(x, raw)
    assert out.shape == (batch, output_size), out.shape
    # bf16 matmul inputs with f32 accumulation -> relaxed tolerance.
    assert jnp.allclose(out, ref, atol=5e-2, rtol=5e-2), (
        "mismatch vs reference; max abs diff = %s" % float(jnp.max(jnp.abs(out - ref))))

    print("KERNEL_OK")
</pallas_src>

<mosaic_0001>
module attributes {stable_mosaic.version = 11 : i64} {
  func.func @kernel(%arg0: i32, %arg1: memref<16x16xf32, #tpu.memory_space<vmem>>, %arg2: memref<16x128xbf16, #tpu.memory_space<vmem>>, %arg3: memref<1x128xf32, #tpu.memory_space<vmem>>, %arg4: memref<128x128xbf16, #tpu.memory_space<vmem>>, %arg5: memref<1x128xf32, #tpu.memory_space<vmem>>, %arg6: memref<128x4xbf16, #tpu.memory_space<vmem>>, %arg7: memref<1x4xf32, #tpu.memory_space<vmem>>, %arg8: memref<16x4xf32, #tpu.memory_space<vmem>>) attributes {dimension_semantics = [#tpu.dimension_semantics<parallel>], iteration_bounds = array<i64: 2>, scalar_prefetch = 0 : i64, scratch_operands = 0 : i64, tpu.core_type = #tpu.core_type<tc>, window_params = [{transform_indices = @transform_0, window_bounds = array<i64: 16, 16>}, {pipeline_mode = #tpu.pipeline_mode<synchronous>, transform_indices = @transform_1, window_bounds = array<i64: 16, 128>}, {pipeline_mode = #tpu.pipeline_mode<synchronous>, transform_indices = @transform_2, window_bounds = array<i64: 1, 128>}, {pipeline_mode = #tpu.pipeline_mode<synchronous>, transform_indices = @transform_3, window_bounds = array<i64: 128, 128>}, {pipeline_mode = #tpu.pipeline_mode<synchronous>, transform_indices = @transform_4, window_bounds = array<i64: 1, 128>}, {pipeline_mode = #tpu.pipeline_mode<synchronous>, transform_indices = @transform_5, window_bounds = array<i64: 128, 4>}, {pipeline_mode = #tpu.pipeline_mode<synchronous>, transform_indices = @transform_6, window_bounds = array<i64: 1, 4>}, {transform_indices = @transform_7, window_bounds = array<i64: 16, 4>}]} {
    %c0 = arith.constant 0 : index
    %c0_0 = arith.constant 0 : index
    %0 = vector.load %arg1[%c0, %c0_0] : memref<16x16xf32, #tpu.memory_space<vmem>>, vector<16x16xf32>
    %c0_1 = arith.constant 0 : index
    %c0_2 = arith.constant 0 : index
    %1 = vector.load %arg2[%c0_1, %c0_2] : memref<16x128xbf16, #tpu.memory_space<vmem>>, vector<16x128xbf16>
    %c0_3 = arith.constant 0 : index
    %c0_4 = arith.constant 0 : index
    %2 = vector.load %arg3[%c0_3, %c0_4] : memref<1x128xf32, #tpu.memory_space<vmem>>, vector<1x128xf32>
    %3 = arith.truncf %0 : vector<16x16xf32> to vector<16x16xbf16>
    %cst = arith.constant dense<0.000000e+00> : vector<16x128xf32>
    %4 = tpu.matmul %3, %1, %cst {dimension_numbers = #tpu.dot_dimension_numbers<[1], [0], [0], [1], [0, 0, 1, 1], [], []>} : vector<16x16xbf16>, vector<16x128xbf16>, vector<16x128xf32> -> vector<16x128xf32>
    %5 = vector.broadcast %2 : vector<1x128xf32> to vector<16x128xf32>
    %6 = arith.addf %4, %5 : vector<16x128xf32>
    %cst_5 = arith.constant 0.000000e+00 : f32
    %7 = vector.broadcast %cst_5 : f32 to vector<16x128xf32>
    %8 = arith.maximumf %6, %7 : vector<16x128xf32>
    %c0_6 = arith.constant 0 : index
    %c0_7 = arith.constant 0 : index
    %9 = vector.load %arg4[%c0_6, %c0_7] : memref<128x128xbf16, #tpu.memory_space<vmem>>, vector<128x128xbf16>
    %c0_8 = arith.constant 0 : index
    %c0_9 = arith.constant 0 : index
    %10 = vector.load %arg5[%c0_8, %c0_9] : memref<1x128xf32, #tpu.memory_space<vmem>>, vector<1x128xf32>
    %11 = arith.truncf %8 : vector<16x128xf32> to vector<16x128xbf16>
    %cst_10 = arith.constant dense<0.000000e+00> : vector<16x128xf32>
    %12 = tpu.matmul %11, %9, %cst_10 {dimension_numbers = #tpu.dot_dimension_numbers<[1], [0], [0], [1], [0, 0, 1, 1], [], []>} : vector<16x128xbf16>, vector<128x128xbf16>, vector<16x128xf32> -> vector<16x128xf32>
    %13 = vector.broadcast %10 : vector<1x128xf32> to vector<16x128xf32>
    %14 = arith.addf %12, %13 : vector<16x128xf32>
    %cst_11 = arith.constant 0.000000e+00 : f32
    %15 = vector.broadcast %cst_11 : f32 to vector<16x128xf32>
    %16 = arith.maximumf %14, %15 : vector<16x128xf32>
    %c0_12 = arith.constant 0 : index
    %c0_13 = arith.constant 0 : index
    %17 = vector.load %arg6[%c0_12, %c0_13] : memref<128x4xbf16, #tpu.memory_space<vmem>>, vector<128x4xbf16>
    %c0_14 = arith.constant 0 : index
    %c0_15 = arith.constant 0 : index
    %18 = vector.load %arg7[%c0_14, %c0_15] : memref<1x4xf32, #tpu.memory_space<vmem>>, vector<1x4xf32>
    %19 = arith.truncf %16 : vector<16x128xf32> to vector<16x128xbf16>
    %cst_16 = arith.constant dense<0.000000e+00> : vector<16x4xf32>
    %20 = tpu.matmul %19, %17, %cst_16 {dimension_numbers = #tpu.dot_dimension_numbers<[1], [0], [0], [1], [0, 0, 1, 1], [], []>} : vector<16x128xbf16>, vector<128x4xbf16>, vector<16x4xf32> -> vector<16x4xf32>
    %21 = vector.broadcast %18 : vector<1x4xf32> to vector<16x4xf32>
    %22 = arith.addf %20, %21 : vector<16x4xf32>
    %c0_17 = arith.constant 0 : index
    %c0_18 = arith.constant 0 : index
    %23 = vector.load %arg8[%c0_17, %c0_18] : memref<16x4xf32, #tpu.memory_space<vmem>>, vector<16x4xf32>
    tpu.vector_store %arg8[%c0_17, %c0_18], %22 {strides = array<i32>} : memref<16x4xf32, #tpu.memory_space<vmem>>, vector<16x4xf32>,
    return
  }
  func.func @transform_0(%arg0: i32) -> (i32, i32) {
    %c0_i32 = arith.constant 0 : i32
    %c0_i32_0 = arith.constant 0 : i32
    return %arg0, %c0_i32 : i32, i32
  }
  func.func @transform_1(%arg0: i32) -> (i32, i32) {
    %c0_i32 = arith.constant 0 : i32
    %c0_i32_0 = arith.constant 0 : i32
    %c0_i32_1 = arith.constant 0 : i32
    return %c0_i32, %c0_i32_0 : i32, i32
  }
  func.func @transform_2(%arg0: i32) -> (i32, i32) {
    %c0_i32 = arith.constant 0 : i32
    %c0_i32_0 = arith.constant 0 : i32
    %c0_i32_1 = arith.constant 0 : i32
    return %c0_i32, %c0_i32_0 : i32, i32
  }
  func.func @transform_3(%arg0: i32) -> (i32, i32) {
    %c0_i32 = arith.constant 0 : i32
    %c0_i32_0 = arith.constant 0 : i32
    %c0_i32_1 = arith.constant 0 : i32
    return %c0_i32, %c0_i32_0 : i32, i32
  }
  func.func @transform_4(%arg0: i32) -> (i32, i32) {
    %c0_i32 = arith.constant 0 : i32
    %c0_i32_0 = arith.constant 0 : i32
    %c0_i32_1 = arith.constant 0 : i32
    return %c0_i32, %c0_i32_0 : i32, i32
  }
  func.func @transform_5(%arg0: i32) -> (i32, i32) {
    %c0_i32 = arith.constant 0 : i32
    %c0_i32_0 = arith.constant 0 : i32
    %c0_i32_1 = arith.constant 0 : i32
    return %c0_i32, %c0_i32_0 : i32, i32
  }
  func.func @transform_6(%arg0: i32) -> (i32, i32) {
    %c0_i32 = arith.constant 0 : i32
    %c0_i32_0 = arith.constant 0 : i32
    %c0_i32_1 = arith.constant 0 : i32
    return %c0_i32, %c0_i32_0 : i32, i32
  }
  func.func @transform_7(%arg0: i32) -> (i32, i32) {
    %c0_i32 = arith.constant 0 : i32
    %c0_i32_0 = arith.constant 0 : i32
    return %arg0, %c0_i32 : i32, i32
  }
}

</mosaic_0001>

<bundles_post_ra>
// kernel: tpu_custom_call.1
= control target key start
LH: loop header
LB: loop body
LE: loop exit
PB: predicated region body
PF: predicated region fallthrough
CT: control target
= control target key end

     0   :  { %s810_s24 = smov 0   ;;  %s917_s0 = inlined_call_operand.vmem [shape: f32[32,16], index: 0, kind: input, shape index: {}]   ;;  %s918_s1 = inlined_call_operand.vmem [shape: bf16[16,128], index: 1, kind: input, shape index: {}]   ;;  %s919_s2 = inlined_call_operand.vmem [shape: f32[1,128], index: 2, kind: input, shape index: {}]   ;;  %s920_s3 = inlined_call_operand.vmem [shape: bf16[128,128], index: 3, kind: input, shape index: {}]   ;;  %s921_s4 = inlined_call_operand.vmem [shape: f32[1,128], index: 4, kind: input, shape index: {}]   ;;  %s922_s5 = inlined_call_operand.vmem [shape: bf16[128,4], index: 5, kind: input, shape index: {}]   ;;  %s923_s6 = inlined_call_operand.vmem [shape: f32[1,4], index: 6, kind: input, shape index: {}]   ;;  %s924_s7 = inlined_call_operand.vmem [shape: f32[32,4], index: 7, kind: output, shape index: {}]  }
   0x1 LB: > { %s635_s25 = sadd.s32 4294967295, %s766_s24   ;;  %p639_p0 = scmp.ge.s32.totalorder %s766_s24, 1  ;;  %s766_s24 = sphi %s810_s24, %s17_s24  }
   0x2   : > { %p238_p1 = scmp.lt.s32.totalorder %s766_s24, 3 }
   0x4   : > { %p239_p2 = pnand %p639_p0, %p238_p1 }
   0x5   : > { %v743_v0 = vld [vmem:[%s918_s1] sm:$0xff] (!%p239_p2)   ;;  %v768_v1 = vmov (!%p239_p2), 0.0   ;;  %s640_s28 = sshll.u32 (!%p239_p2), %s635_s25, 1  ;;  %vm769_vm0 = vmmov (!%p239_p2), 0   ;;  %v745_v3 = vld [vmem:[%s920_s3 + $0x8] sm:$0xff] (!%p239_p2)   ;;  %v746_v4 = vld [vmem:[%s920_s3 + $0x10] sm:$0xff] (!%p239_p2)  }
   0x6   : > { %242 = sbr.rel (%p239_p2) target bundleno = 676 (0x2a4), region = 48  ;;  %687 = vmatprep.subr.bf16.mxu0 (!%p239_p2), %v768_v1  ;;  %693 = vmatprep.subr.bf16.mxu1 (!%p239_p2), %v768_v1  ;;  %v744_v2 = vld [vmem:[%s920_s3] sm:$0xff] (!%p239_p2)   ;;  %p271_p3 = scmp.lt.s32.totalorder (!%p239_p2), %s640_s28, 3  ;;  %vm301_vm1 = vcmask (!%p239_p2), 130048   ;;  %v747_v8 = vld [vmem:[%s920_s3 + $0x18] sm:$0xff] (!%p239_p2)   ;;  %v749_v10 = vld [vmem:[%s920_s3 + $0x28] sm:$0xff] (!%p239_p2)  }
   0x7   : > { %688 = vmatpush3.bf16.msra.mxu0 (!%p239_p2), %v743_v0  ;;  %689 = vmatprep.mubr.msk.bf16.mxu0 (!%p239_p2), %vm769_vm0, %v768_v1  ;;  %v748_v9 = vld [vmem:[%s920_s3 + $0x20] sm:$0xff] (!%p239_p2)   ;;  %v750_v11 = vld [vmem:[%s920_s3 + $0x30] sm:$0xff] (!%p239_p2)   ;;  %v751_v12 = vld [vmem:[%s920_s3 + $0x38] sm:$0xff] (!%p239_p2)   ;;  %vm576_vm2 = vcmask (!%p239_p2), 31744  }
   0x8   : > { %694 = vmatpush3.bf16.msra.mxu1 (!%p239_p2), %v744_v2  ;;  %709 = vmatprep.mubr.msk.bf16.mxu1 (!%p239_p2), %vm769_vm0, %v768_v1  ;;  %v752_v13 = vld [vmem:[%s922_s5] sm:$0xff] (!%p239_p2)   ;;  %v753_v14 = vld [vmem:[%s922_s5 + $0x8] sm:$0xff] (!%p239_p2)   ;;  %v754_v15 = vld [vmem:[%s922_s5 + $0x10] sm:$0xff] (!%p239_p2)  }
   0x9   : > { %695 = vmatprep.subr.bf16.mxu1 (!%p239_p2), %v768_v1  ;;  %713 = vmatprep.subr.bf16.mxu0 (!%p239_p2), %v768_v1  ;;  %v755_v16 = vld [vmem:[%s922_s5 + $0x18] sm:$0xff] (!%p239_p2)   ;;  %v756_v17 = vld [vmem:[%s922_s5 + $0x20] sm:$0xff] (!%p239_p2)   ;;  %v757_v18 = vld [vmem:[%s922_s5 + $0x28] sm:$0xff] (!%p239_p2)  }
   0xa   : > { %v644_v19 = vld [vmem:[%s919_s2] ss:$0 sm:$0xff] (!%p239_p2)  ;;  %v758_v29 = vld [vmem:[%s922_s5 + $0x30] sm:$0xff] (!%p239_p2)   ;;  %v759_v30 = vld [vmem:[%s922_s5 + $0x38] sm:$0xff] (!%p239_p2)  }
   0xb   : > { %v647_v31 = vld [vmem:[%s921_s4] ss:$0 sm:$0xff] (!%p239_p2) }
   0xc   : > { %696 = vmatpush3.bf16.msra.mxu1 (!%p239_p2), %v745_v3  ;;  %v656_v41 = vld [vmem:[%s923_s6] ss:$0 sm:$0xff] (!%p239_p2) }
   0xd   : > { %s926_s28 = smov (!%p271_p3, %s640_s28), 3  ;;  %697 = vmatprep.subr.bf16.mxu1 %v768_v1 }
   0xe   : > { %s641_s10 = sshll.u32 %s926_s28, 3 }
   0xf   : > { %s274_s13 = scalar_lea.vmem %s917_s0, %s641_s10  ;;  %s280_s9 = scalar_lea.vmem %s924_s7, %s641_s10 }
  0x10   : > { %v283_v5 = vld [vmem:[%s274_s13] sm:$0xff]  ;;  %v284_v6 = vld [vmem:[%s274_s13 + $0x8] sm:$0xff]  ;;  %698 = vmatpush3.bf16.msra.mxu1 %v746_v4 }
  0x11   : > { %v288_v7 = vpack.c.bf16 %v284_v6, %v283_v5  ;;  %699 = vmatprep.subr.bf16.mxu1 %v768_v1 }
  0x13   : > { %690 = vmatmul.mubr.msk.bf16.vlgmr.msra.gmra.mrb[0].mxu0 %vm301_vm1, %v288_v7 }
  0x14   : > { %729 = vmatprep.mubr.msk.bf16.mxu0 %vm769_vm0, %v768_v1  ;;  %700 = vmatpush3.bf16.msra.mxu1 %v747_v8 }
  0x15   : > { %701 = vmatprep.subr.bf16.mxu1 %v768_v1  ;;  %714 = vmatpush3.bf16.msra.mxu0 %v752_v13 }
  0x16   : > { %715 = vmatprep.subr.bf16.mxu0 %v768_v1 }
  0x18   : > { %702 = vmatpush3.bf16.msra.mxu1 %v748_v9 }
  0x19   : > { %703 = vmatprep.subr.bf16.mxu1 %v768_v1  ;;  %716 = vmatpush3.bf16.msra.mxu0 %v753_v14 }
  0x1a   : > { %717 = vmatprep.subr.bf16.mxu0 %v768_v1 }
  0x1c   : > { %704 = vmatpush3.bf16.msra.mxu1 %v749_v10 }
  0x1d   : > { %705 = vmatprep.subr.bf16.mxu1 %v768_v1  ;;  %718 = vmatpush3.bf16.msra.mxu0 %v754_v15 }
  0x1e   : > { %719 = vmatprep.subr.bf16.mxu0 %v768_v1 }
  0x20   : > { %706 = vmatpush3.bf16.msra.mxu1 %v750_v11 }
  0x21   : > { %707 = vmatprep.subr.bf16.mxu1 %v768_v1  ;;  %720 = vmatpush3.bf16.msra.mxu0 %v755_v16 }
  0x22   : > { %721 = vmatprep.subr.bf16.mxu0 %v768_v1 }
  0x24   : > { %708 = vmatpush3.bf16.msra.mxu1 %v751_v12 }
  0x25   : > { %722 = vmatpush3.bf16.msra.mxu0 %v756_v17 }
  0x26   : > { %723 = vmatprep.subr.bf16.mxu0 %v768_v1 }
  0x29   : > { %724 = vmatpush3.bf16.msra.mxu0 %v757_v18 }
  0x2a   : > { %725 = vmatprep.subr.bf16.mxu0 %v768_v1 }
  0x2d   : > { %726 = vmatpush3.bf16.msra.mxu0 %v758_v29 }
  0x2e   : > { %727 = vmatprep.subr.bf16.mxu0 %v768_v1 }
  0x31   : > { %728 = vmatpush3.bf16.msra.mxu0 %v759_v30 }
  0xe6   : > { %v339_v20 = vpop.f32.mrb[0].mxu0 }
  0xe7   : > { %v340_v21 = vadd.f32 %v644_v19, %v339_v20  ;;  %v691_v22 = vpop.f32.mrb[1].mxu0 }
  0xe8   : > { %v342_v23 = vpop.f32.mrb[2].mxu0 }
  0xe9   : > { %v343_v24 = vadd.f32 %v644_v19, %v342_v23  ;;  %v692_v25 = vpop.f32.mrb[3].mxu0  ;;  %v346_v26 = vmax.f32 %v340_v21, 0.0 }
  0xeb   : > { %v347_v27 = vmax.f32 %v343_v24, 0.0 }
  0xed   : > { %v365_v28 = vpack.c.bf16 %v347_v27, %v346_v26 }
  0xef   : > { %710 = vmatmul.mubr.bf16.vlgmr.msra.gmra.mrb[0].mxu1 %v365_v28 }
 0x1c2   : > { %v454_v32 = vpop.f32.mrb[0].mxu1 }
 0x1c3   : > { %v455_v33 = vadd.f32 %v647_v31, %v454_v32  ;;  %v711_v34 = vpop.f32.mrb[1].mxu1 }
 0x1c4   : > { %v457_v35 = vpop.f32.mrb[2].mxu1 }
 0x1c5   : > { %v458_v36 = vadd.f32 %v647_v31, %v457_v35  ;;  %v712_v37 = vpop.f32.mrb[3].mxu1  ;;  %v461_v38 = vmax.f32 %v455_v33, 0.0 }
 0x1c7   : > { %v462_v39 = vmax.f32 %v458_v36, 0.0 }
 0x1c9   : > { %v480_v40 = vpack.c.bf16 %v462_v39, %v461_v38 }
 0x1cb   : > { %730 = vmatmul.mubr.bf16.vlgmr.msra.gmra.mrb[4].mxu0 %v480_v40 }
 0x29e   : > { %v569_v42 = vpop.f32.mrb[4].mxu0 }
 0x29f   : > { %v570_v43 = vadd.f32 %v656_v41, %v569_v42  ;;  %v731_v44 = vpop.f32.mrb[5].mxu0 }
 0x2a0   : > { %v572_v45 = vpop.f32.mrb[6].mxu0 }
 0x2a1   : > { %577 = vst.msk [vmem:[%s280_s9] sm:$0xff] %vm576_vm2, %v570_v43  ;;  %v573_v46 = vadd.f32 %v656_v41, %v572_v45  ;;  %v732_v47 = vpop.f32.mrb[7].mxu0 }
 0x2a3   : > { %578 = vst.msk [vmem:[%s280_s9 + $0x8] sm:$0xff] %vm576_vm2, %v573_v46 }
 0x2a4 PF: > { %s17_s24 = sadd.s32 1, %s766_s24  }
 0x2a5   : > { %p14_p4 = scmp.ge.s32.totalorder %s17_s24, 4  }
 0x2a7   :  { %16 = sbr.rel (!%p14_p4) target bundleno = 1 (0x1), region = 78 }

</bundles_post_ra>
